<compile_context>
chip_gen: v5e
topology: v5e:2x2
jax: 0.10.0
libtpu: 0.0.40
codegen_flags: <defaults>
</compile_context>

<pallas_src>
import functools

import numpy as np
import jax
import jax.numpy as jnp
from jax.experimental import pallas as pl
from jax.experimental.pallas import tpu as pltpu


# ----------------------------------------------------------------------------
# Kernel: masked reward-weighted logprob sum + mask count for ONE list element
# ----------------------------------------------------------------------------
def _reward_kernel(seq_ref, logp_ref, rd_ref, acc_ref, *,
                   batch, n_row_tiles, tiles_per_core):
    c = pl.program_id(0)            # core-split index            ("parallel")
    r = pl.program_id(1)            # row-tile index within core  ("arbitrary")
    tile_idx = c * tiles_per_core + r

    @pl.when(r == 0)
    def _init():
        acc_ref[...] = jnp.zeros_like(acc_ref)

    @pl.when(tile_idx < n_row_tiles)            # skip clamped overflow tiles
    def _accumulate():
        seq = seq_ref[...]                           # (tile_r, T) int
        logp = logp_ref[...].astype(jnp.float32)     # (tile_r, T)
        rd = rd_ref[...].astype(jnp.float32)         # (tile_r, 1) per-sample reward
        tile_r, t = seq.shape

        # mask[i, j] = 1 iff no zero token occurs strictly before position j
        # (== reference's truncate-after-first-zero + shifted (seq>0) mask)
        # and the row is a real (non-padding / in-bounds) sample.
        pos = jax.lax.broadcasted_iota(jnp.int32, (tile_r, t), 1)
        first_zero = jnp.min(jnp.where(seq == 0, pos, t), axis=1, keepdims=True)
        row = (jax.lax.broadcasted_iota(jnp.int32, (tile_r, t), 0)
               + tile_idx * tile_r)
        valid = (pos <= first_zero) & (row < batch)

        mask = valid.astype(jnp.float32)
        # Select (not multiply) so garbage rows of a partial boundary block can
        # never leak NaN/Inf into the sum.
        weighted = jnp.where(valid, (-logp) * rd, 0.0)

        # Fold each quantity to a single lane vector and accumulate into the
        # merged (2, T) resident output block; the one cross-lane reduce per
        # element happens in the wrapper after the grid finishes.
        upd = jnp.concatenate(
            [jnp.sum(weighted, axis=0, keepdims=True),
             jnp.sum(mask, axis=0, keepdims=True)], axis=0)       # (2, T)
        acc_ref[0] += upd


# ----------------------------------------------------------------------------
# VMEM / generation-aware tiling helpers
# ----------------------------------------------------------------------------
def _round_up(x, m):
    return ((x + m - 1) // m) * m


def _vmem_capacity_bytes():
    try:
        return int(pltpu.get_tpu_info().vmem_capacity_bytes)
    except Exception:
        return 64 << 20    # conservative fallback (v7x); perf-only, never correctness


def _stream_bytes_per_row(t, seq_dtype, logp_dtype):
    # seq + logp blocks, double-buffered, plus the (tile_r, 1) f32 reward column.
    return 2 * t * (jnp.dtype(seq_dtype).itemsize
                    + jnp.dtype(logp_dtype).itemsize) + 2 * 4


def _choose_tile_rows(t, seq_dtype, logp_dtype):
    cap = _vmem_capacity_bytes()
    # Target ~half of physical VMEM (~32 MiB on v7x's 64 MiB, ~64 MiB on
    # v5e/v6e's 128 MiB), leaving headroom for Mosaic-internal scratch and the
    # resident accumulator.  Tiles up to 4096 rows keep per-step overhead low.
    budget = max(4 << 20, min(cap // 2, cap - (24 << 20)))
    tile = budget // max(1, _stream_bytes_per_row(t, seq_dtype, logp_dtype))
    return int(max(8, min(4096, (tile // 8) * 8)))


# ----------------------------------------------------------------------------
# Per-element wrapper: one fused pallas_call, no pad/stack prepass
# ----------------------------------------------------------------------------
def _element_masked_sums(seq, logp, rd_col, *, num_core_splits=2, tile_rows=None):
    """Returns (sum(-logp * reward * mask), sum(mask)) for one list element."""
    assert seq.shape == logp.shape and rd_col.shape == (seq.shape[0], 1)
    batch, t = seq.shape

    # Sub-32-bit logp packs along sublanes; keep row tiles aligned to its tile.
    align = max(8, 32 // jnp.dtype(logp.dtype).itemsize)
    b_pad = _round_up(batch, align)
    if b_pad != batch:                    # tiny copy, only when batch unaligned
        seq = jnp.pad(seq, ((0, b_pad - batch), (0, 0)))
        logp = jnp.pad(logp, ((0, b_pad - batch), (0, 0)))
        rd_col = jnp.pad(rd_col, ((0, b_pad - batch), (0, 0)))

    if tile_rows is None:
        tile_rows = _choose_tile_rows(t, seq.dtype, logp.dtype)
    tile_rows = int(max(align, (min(tile_rows, b_pad) // align) * align))

    n_tiles = pl.cdiv(b_pad, tile_rows)
    nc = max(1, min(num_core_splits, n_tiles))     # megacore row split (v7x)
    rt = pl.cdiv(n_tiles, nc)

    if nc * rt == n_tiles:
        row_map = lambda c, r: (c * rt + r, 0)
    else:   # clamp overflow tiles onto a valid block; the kernel skips them
        row_map = lambda c, r: (jnp.minimum(c * rt + r, n_tiles - 1), 0)

    cap = _vmem_capacity_bytes()
    needed = (tile_rows * _stream_bytes_per_row(t, seq.dtype, logp.dtype)
              + 4 * 2 * t * 4 + (4 << 20))
    vmem_limit = int(min(max(needed, 16 << 20), max(cap - (16 << 20), 32 << 20)))

    kernel = functools.partial(_reward_kernel, batch=batch,
                               n_row_tiles=n_tiles, tiles_per_core=rt)

    acc = pl.pallas_call(
        kernel,
        out_shape=jax.ShapeDtypeStruct((nc, 2, t), jnp.float32),
        grid_spec=pltpu.PrefetchScalarGridSpec(
            num_scalar_prefetch=0,
            grid=(nc, rt),
            in_specs=[pl.BlockSpec((tile_rows, t), row_map),   # seq (native int)
                      pl.BlockSpec((tile_rows, t), row_map),   # logp (native dtype)
                      pl.BlockSpec((tile_rows, 1), row_map)],  # per-sample reward
            out_specs=pl.BlockSpec((1, 2, t), lambda c, r: (c, 0, 0)),
        ),
        compiler_params=pltpu.CompilerParams(
            dimension_semantics=("parallel", "arbitrary"),
            vmem_limit_bytes=vmem_limit,
        ),
    )(seq, logp, rd_col)

    sums = jnp.sum(acc, axis=(0, 2))        # single cross-lane reduce, once
    return sums[0], sums[1]


# ----------------------------------------------------------------------------
# Full forward math (all list elements)
# ----------------------------------------------------------------------------
def reward_mul_out_losses(list_sample_seq, list_sample_seqLogprobs,
                          list_reward_diff, gammas, *,
                          num_core_splits=2, tile_rows=None):
    """Returns (final_loss, final_reward_diff_mean).

    list_reward_diff[i] is the per-sample self-critical reward, shape (B,);
    get_self_critical_reward repeats it across T, so a row-constant (B, T)
    matrix is also accepted (its first column is used).
    """
    n_elem = len(list_sample_seq)
    assert n_elem == len(list_sample_seqLogprobs) == len(list_reward_diff) == len(gammas)

    losses, rd_means = [], []
    for i in range(n_elem):
        seq = jnp.asarray(list_sample_seq[i])
        logp = jnp.asarray(list_sample_seqLogprobs[i])
        rd = jnp.asarray(list_reward_diff[i], jnp.float32)
        if rd.ndim == 2:                      # row-constant (B, T) reward matrix
            rd = rd[:, 0]
        w_sum, m_sum = _element_masked_sums(
            seq, logp, rd.reshape(-1, 1),
            num_core_splits=num_core_splits, tile_rows=tile_rows)
        losses.append(jnp.float32(gammas[i]) * w_sum / m_sum)
        rd_means.append(jnp.mean(rd))
    return jnp.mean(jnp.stack(losses)), jnp.mean(jnp.stack(rd_means))


# ----------------------------------------------------------------------------
# Stateful module wrapper (host-side bookkeeping of the original module)
# ----------------------------------------------------------------------------
class RewardMulOutCriterion:
    """Mirrors the PyTorch module's running statistics; heavy math -> Pallas.

    TODO(synk): utils.get_self_critical_reward (CIDEr scoring of sampled vs.
    greedy captions against ground truth) is host-side text-metric code with no
    Pallas equivalent; per-sample reward_diff / sample_mean / greedy_mean are
    taken as precomputed inputs.  The original per-element print() logging is
    omitted.
    """

    def __init__(self, rl_alpha_type=0, rl_alpha_start=1.0,
                 rl_alpha_recent_start=1.0, rl_alpha_recent_num=10,
                 rl_beta=1.0, rl_gamma=1.0, rl_use_gamma=False):
        self.reward_sample_total = 0.0
        self.reward_greedy_total = 0.0
        self.reward_num = 0
        self.alpha_type = rl_alpha_type
        self.alpha = rl_alpha_start
        self.recent_alpha = rl_alpha_recent_start
        self.recent_num = rl_alpha_recent_num
        self.recent_alpha_list = np.zeros(self.recent_num)
        self.recent_gamma_list = np.zeros(self.recent_num)
        self.recent_index = 0
        self.recent_gamma = 1.0
        self.beta = rl_beta
        self.gamma = rl_gamma
        self.use_gamma = rl_use_gamma

    def forward(self, list_sample_seq, list_sample_seqLogprobs,
                list_reward_diff, list_sample_mean, list_greedy_mean):
        gammas = []
        for i in range(len(list_sample_seq)):
            sample_mean = float(list_sample_mean[i])
            greedy_mean = float(list_greedy_mean[i])
            if self.alpha_type == 0:
                temp_alpha = 1.0
            elif self.alpha_type == 1:
                temp_alpha = self.recent_alpha * self.beta
            else:
                temp_alpha = self.alpha * self.beta
            self.reward_sample_total += sample_mean
            self.reward_greedy_total += greedy_mean
            self.reward_num += 1
            self.alpha = self.reward_sample_total / self.reward_greedy_total
            self.recent_alpha_list[self.recent_index % self.recent_num] = (
                sample_mean / greedy_mean)
            diff = sample_mean - greedy_mean * temp_alpha
            self.recent_gamma_list[self.recent_index % self.recent_num] = (
                1.0 if diff == 0 else 1.0 / abs(diff))
            self.recent_index += 1
            n = min(self.recent_index, self.recent_num)
            self.recent_alpha = float(np.mean(self.recent_alpha_list[:n]))
            self.recent_gamma = float(np.mean(self.recent_gamma_list[:n]))
            gammas.append(self.recent_gamma * self.gamma if self.use_gamma else 1.0)

        final_loss, final_rd_mean = reward_mul_out_losses(
            list_sample_seq, list_sample_seqLogprobs, list_reward_diff, gammas)
        return (final_loss, final_rd_mean,
                float(np.mean([float(x) for x in list_sample_mean])),
                float(np.mean([float(x) for x in list_greedy_mean])))


# ----------------------------------------------------------------------------
# Pure-JAX reference for validation
# ----------------------------------------------------------------------------
def _reference(list_sample_seq, list_sample_seqLogprobs, list_reward_diff, gammas):
    losses, rd_means = [], []
    for seq, logp, rd, g in zip(list_sample_seq, list_sample_seqLogprobs,
                                list_reward_diff, gammas):
        rd = jnp.asarray(rd, jnp.float32)
        if rd.ndim == 1:
            rd = jnp.broadcast_to(rd[:, None], seq.shape)
        alive = jnp.cumprod((seq > 0).astype(jnp.float32), axis=1)
        mask = jnp.concatenate(
            [jnp.ones((seq.shape[0], 1), jnp.float32), alive[:, :-1]], axis=1)
        out = -logp.astype(jnp.float32) * rd * mask * g
        losses.append(out.sum() / mask.sum())
        rd_means.append(rd.mean())
    return jnp.mean(jnp.stack(losses)), jnp.mean(jnp.stack(rd_means))


if __name__ == "__main__":
    key = jax.random.PRNGKey(0)
    batch, vocab = 4, 12
    seq_lens = [8, 6]                 # per-list-element sequence lengths
    gammas = [1.0, 0.75]

    k_seq, k_logp, k_rd = jax.random.split(key, 3)
    list_seq, list_logp, list_rd = [], [], []
    for i, t in enumerate(seq_lens):
        ks = jax.random.fold_in(k_seq, i)
        seq = jax.random.randint(ks, (batch, t), 0, vocab, dtype=jnp.int32)
        seq = seq.at[:, 0].set(jnp.maximum(seq[:, 0], 1))   # non-empty start
        seq = seq.at[1, t // 2].set(0)                      # guarantee an early EOS
        kl = jax.random.fold_in(k_logp, i)
        logp = -jnp.abs(jax.random.normal(kl, (batch, t), dtype=jnp.float32))
        kr = jax.random.fold_in(k_rd, i)
        rd = jax.random.normal(kr, (batch,), dtype=jnp.float32)   # per-sample reward
        list_seq.append(seq)
        list_logp.append(logp)
        list_rd.append(rd)

    loss, rd_mean = reward_mul_out_losses(list_seq, list_logp, list_rd, gammas)
    loss, rd_mean = jax.block_until_ready((loss, rd_mean))
    ref_loss, ref_rd_mean = _reference(list_seq, list_logp, list_rd, gammas)
    assert jnp.allclose(loss, ref_loss, rtol=1e-5, atol=1e-5), (loss, ref_loss)
    assert jnp.allclose(rd_mean, ref_rd_mean, rtol=1e-5, atol=1e-5), (rd_mean, ref_rd_mean)

    # Second case: bf16 logprobs, larger batch, forced small row tiles so the
    # core-split clamp path and the row-padding guard are exercised.
    b2, t2 = 40, 24
    k2a, k2b, k2c = jax.random.split(jax.random.PRNGKey(1), 3)
    seq2 = jax.random.randint(k2a, (b2, t2), 0, 5, dtype=jnp.int32)
    seq2 = seq2.at[:, 0].set(jnp.maximum(seq2[:, 0], 1))
    logp2 = -jnp.abs(jax.random.normal(k2b, (b2, t2))).astype(jnp.bfloat16)
    rd2 = jax.random.normal(k2c, (b2,), dtype=jnp.float32)
    loss2, rdm2 = reward_mul_out_losses([seq2], [logp2], [rd2], [0.5], tile_rows=16)
    loss2, rdm2 = jax.block_until_ready((loss2, rdm2))
    ref2_loss, ref2_rdm = _reference([seq2], [logp2], [rd2], [0.5])
    assert jnp.allclose(loss2, ref2_loss, rtol=1e-4, atol=1e-4), (loss2, ref2_loss)
    assert jnp.allclose(rdm2, ref2_rdm, rtol=1e-4, atol=1e-4), (rdm2, ref2_rdm)

    # Exercise the stateful module wrapper end-to-end as well.
    crit = RewardMulOutCriterion(rl_alpha_type=2, rl_gamma=0.5, rl_use_gamma=True)
    res = crit.forward(list_seq, list_logp, list_rd,
                       list_sample_mean=[1.2, 1.1], list_greedy_mean=[1.0, 1.05])
    jax.block_until_ready(res[0])

    print("KERNEL_OK")
</pallas_src>

<mosaic_0001>
module attributes {stable_mosaic.version = 11 : i64} {
  func.func @_reward_kernel(%arg0: i32, %arg1: i32, %arg2: memref<8x8xi32, #tpu.memory_space<vmem>>, %arg3: memref<8x8xf32, #tpu.memory_space<vmem>>, %arg4: memref<8x1xf32, #tpu.memory_space<vmem>>, %arg5: memref<1x2x8xf32, #tpu.memory_space<vmem>>) attributes {dimension_semantics = [#tpu.dimension_semantics<parallel>, #tpu.dimension_semantics<arbitrary>], iteration_bounds = array<i64: 1, 1>, scalar_prefetch = 0 : i64, scratch_operands = 0 : i64, tpu.core_type = #tpu.core_type<tc>, window_params = [{transform_indices = @transform_0, window_bounds = array<i64: 8, 8>}, {transform_indices = @transform_1, window_bounds = array<i64: 8, 8>}, {transform_indices = @transform_2, window_bounds = array<i64: 8, 1>}, {transform_indices = @transform_3, window_bounds = array<i64: 1, 2, 8>}]} {
    %c1_i32 = arith.constant 1 : i32
    %0 = arith.muli %arg0, %c1_i32 : i32
    %1 = arith.addi %0, %arg1 : i32
    %c0_i32 = arith.constant 0 : i32
    %2 = arith.cmpi eq, %arg1, %c0_i32 : i32
    %3 = arith.extui %2 : i1 to i32
    %c0_i32_0 = arith.constant 0 : i32
    %4 = arith.cmpi ne, %3, %c0_i32_0 : i32
    scf.if %4 {
      %cst = arith.constant 0.000000e+00 : f32
      %8 = vector.broadcast %cst : f32 to vector<1x2x8xf32>
      %c0 = arith.constant 0 : index
      %c0_3 = arith.constant 0 : index
      %c0_4 = arith.constant 0 : index
      %9 = vector.load %arg5[%c0, %c0_3, %c0_4] : memref<1x2x8xf32, #tpu.memory_space<vmem>>, vector<1x2x8xf32>
      tpu.vector_store %arg5[%c0, %c0_3, %c0_4], %8 {strides = array<i32>} : memref<1x2x8xf32, #tpu.memory_space<vmem>>, vector<1x2x8xf32>,
    } else {
    }
    %c1_i32_1 = arith.constant 1 : i32
    %5 = arith.cmpi slt, %1, %c1_i32_1 : i32
    %6 = arith.extui %5 : i1 to i32
    %c0_i32_2 = arith.constant 0 : i32
    %7 = arith.cmpi ne, %6, %c0_i32_2 : i32
    scf.if %7 {
      %c0 = arith.constant 0 : index
      %c0_3 = arith.constant 0 : index
      %8 = vector.load %arg2[%c0, %c0_3] : memref<8x8xi32, #tpu.memory_space<vmem>>, vector<8x8xi32>
      %c0_4 = arith.constant 0 : index
      %c0_5 = arith.constant 0 : index
      %9 = vector.load %arg3[%c0_4, %c0_5] : memref<8x8xf32, #tpu.memory_space<vmem>>, vector<8x8xf32>
      %c0_6 = arith.constant 0 : index
      %c0_7 = arith.constant 0 : index
      %10 = vector.load %arg4[%c0_6, %c0_7] : memref<8x1xf32, #tpu.memory_space<vmem>>, vector<8x1xf32>
      %11 = tpu.iota {dimensions = array<i32: 1>} : vector<8x8xi32>
      %c0_i32_8 = arith.constant 0 : i32
      %12 = vector.broadcast %c0_i32_8 : i32 to vector<8x8xi32>
      %13 = arith.cmpi eq, %8, %12 : vector<8x8xi32>
      %c8_i32 = arith.constant 8 : i32
      %14 = vector.broadcast %c8_i32 : i32 to vector<8x8xi32>
      %15 = arith.select %13, %11, %14 : vector<8x8xi1>, vector<8x8xi32>
      %cst = arith.constant dense<2147483647> : vector<8xi32>
      %16 = vector.multi_reduction <minsi>, %15, %cst [1] : vector<8x8xi32> to vector<8xi32>
      %17 = vector.shape_cast %16 : vector<8xi32> to vector<8x1xi32>
      %18 = tpu.iota {dimensions = array<i32: 0>} : vector<8x8xi32>
      %c8_i32_9 = arith.constant 8 : i32
      %19 = arith.muli %1, %c8_i32_9 : i32
      %20 = vector.broadcast %19 : i32 to vector<8x8xi32>
      %21 = arith.addi %18, %20 : vector<8x8xi32>
      %22 = vector.broadcast %17 : vector<8x1xi32> to vector<8x8xi32>
      %23 = arith.cmpi sle, %11, %22 : vector<8x8xi32>
      %c4_i32 = arith.constant 4 : i32
      %24 = vector.broadcast %c4_i32 : i32 to vector<8x8xi32>
      %25 = arith.cmpi slt, %21, %24 : vector<8x8xi32>
      %26 = arith.andi %23, %25 : vector<8x8xi1>
      %27 = arith.extui %26 : vector<8x8xi1> to vector<8x8xi32>
      %28 = arith.sitofp %27 : vector<8x8xi32> to vector<8x8xf32>
      %cst_10 = arith.constant 0.000000e+00 : f32
      %29 = vector.broadcast %cst_10 : f32 to vector<8x8xf32>
      %30 = arith.subf %29, %9 : vector<8x8xf32>
      %31 = vector.broadcast %10 : vector<8x1xf32> to vector<8x8xf32>
      %32 = arith.mulf %30, %31 : vector<8x8xf32>
      %cst_11 = arith.constant 0.000000e+00 : f32
      %33 = vector.broadcast %cst_11 : f32 to vector<8x8xf32>
      %34 = arith.select %26, %32, %33 : vector<8x8xi1>, vector<8x8xf32>
      %cst_12 = arith.constant dense<0.000000e+00> : vector<8xf32>
      %35 = vector.multi_reduction <add>, %34, %cst_12 [0] : vector<8x8xf32> to vector<8xf32>
      %36 = vector.shape_cast %35 : vector<8xf32> to vector<1x8xf32>
      %cst_13 = arith.constant dense<0.000000e+00> : vector<8xf32>
      %37 = vector.multi_reduction <add>, %28, %cst_13 [0] : vector<8x8xf32> to vector<8xf32>
      %38 = vector.shape_cast %37 : vector<8xf32> to vector<1x8xf32>
      %39 = tpu.concatenate %36, %38 in 0 : vector<1x8xf32>, vector<1x8xf32> -> vector<2x8xf32>
      %c0_14 = arith.constant 0 : index
      %c0_15 = arith.constant 0 : index
      %c0_16 = arith.constant 0 : index
      %40 = vector.load %arg5[%c0_14, %c0_15, %c0_16] : memref<1x2x8xf32, #tpu.memory_space<vmem>>, vector<1x2x8xf32>
      %41 = vector.shape_cast %40 : vector<1x2x8xf32> to vector<2x8xf32>
      %42 = arith.addf %41, %39 : vector<2x8xf32>
      %c0_17 = arith.constant 0 : index
      %c0_18 = arith.constant 0 : index
      %c0_19 = arith.constant 0 : index
      %43 = vector.load %arg5[%c0_17, %c0_18, %c0_19] : memref<1x2x8xf32, #tpu.memory_space<vmem>>, vector<1x2x8xf32>
      %44 = vector.shape_cast %43 : vector<1x2x8xf32> to vector<2x8xf32>
      %45 = vector.shape_cast %42 : vector<2x8xf32> to vector<1x2x8xf32>
      tpu.vector_store %arg5[%c0_17, %c0_18, %c0_19], %45 {strides = array<i32>} : memref<1x2x8xf32, #tpu.memory_space<vmem>>, vector<1x2x8xf32>,
    } else {
    }
    return
  }
  func.func @transform_0(%arg0: i32, %arg1: i32) -> (i32, i32) {
    %c1_i32 = arith.constant 1 : i32
    %0 = arith.muli %arg0, %c1_i32 : i32
    %1 = arith.addi %0, %arg1 : i32
    %c0_i32 = arith.constant 0 : i32
    %c0_i32_0 = arith.constant 0 : i32
    return %1, %c0_i32 : i32, i32
  }
  func.func @transform_1(%arg0: i32, %arg1: i32) -> (i32, i32) {
    %c1_i32 = arith.constant 1 : i32
    %0 = arith.muli %arg0, %c1_i32 : i32
    %1 = arith.addi %0, %arg1 : i32
    %c0_i32 = arith.constant 0 : i32
    %c0_i32_0 = arith.constant 0 : i32
    return %1, %c0_i32 : i32, i32
  }
  func.func @transform_2(%arg0: i32, %arg1: i32) -> (i32, i32) {
    %c1_i32 = arith.constant 1 : i32
    %0 = arith.muli %arg0, %c1_i32 : i32
    %1 = arith.addi %0, %arg1 : i32
    %c0_i32 = arith.constant 0 : i32
    %c0_i32_0 = arith.constant 0 : i32
    return %1, %c0_i32 : i32, i32
  }
  func.func @transform_3(%arg0: i32, %arg1: i32) -> (i32, i32, i32) {
    %c0_i32 = arith.constant 0 : i32
    %c0_i32_0 = arith.constant 0 : i32
    %c0_i32_1 = arith.constant 0 : i32
    return %arg0, %c0_i32, %c0_i32_0 : i32, i32, i32
  }
}

</mosaic_0001>

<bundles_post_ra>
// kernel: tpu_custom_call.1
= control target key start
LH: loop header
LB: loop body
LE: loop exit
PB: predicated region body
PF: predicated region fallthrough
CT: control target
= control target key end

     0   :  { %8 = vsyncpa [#allocation3], 0  ;;  %s268_s0 = inlined_call_operand.vmem [shape: s32[8,8], index: 0, kind: input, shape index: {}]   ;;  %s269_s1 = inlined_call_operand.hbm [shape: f32[8,8], index: 1, kind: input, shape index: {}]   ;;  %s270_s2 = inlined_call_operand.vmem [shape: f32[8,1], index: 2, kind: input, shape index: {}]   ;;  %s271_s3 = inlined_call_operand.hbm [shape: f32[1,2,8], index: 3, kind: output, shape index: {}]  }
   0x1   :  { %9 = vsyncpa [#allocation4], 0  ;;  %s26_s14 = sshll.u32 %s269_s1, 4  ;;  %s227_s15 = smov [#allocation2]   ;;  %s27_s14 = int_to_ptr.hbm [resolvable:$true] %s26_s14 }
   0x2   :  { %s28_s16 = sshll.u32 %s227_s15, 4  ;;  %s29_s16 = int_to_ptr.vmem [resolvable:$true] %s28_s16 }
   0x3   :  { %31 = dma.hbm_to_vmem [thread:$0]  %s27_s14, 128, %s29_s16, [#allocation3]  }
   0x4   :  { %223 = dma.done.wait [#allocation3], 128  }
   0x5   :  { %224 = vsyncadd [#allocation3], 4294967168  ;;  %v81_v0 = vlaneseq  ;;  %v78_v2 = vld [vmem:[%s268_s0] sm:$0xff]  ;;  %vm85_vm0 = vcmask 64512   ;;  %v228_v8 = vmov 0   ;;  %vm72_vm3 = vcmask 58368  }
   0x6   :  { %vm83_vm1 = vcmp.eq.s32.totalorder %v78_v2, 0  ;;  %v80_v7 = vld [vmem:[%s270_s2] sm:$0xff]  ;;  %173 = vset.pattern.permute.xlu1 %v228_v8  ;;  %174 = vset.pattern.permute.xlu0 %v228_v8  ;;  %v229_v13 = vmov 0.0   ;;  %vm133_vm7 = vcmask 1040384   ;;  %s230_s0 = smov [#allocation5]   ;;  %s146_s22 = sshll.u32 %s271_s3, 4  ;;  %s147_s22 = int_to_ptr.hbm [resolvable:$true] %s146_s22 }
   0x7   :  { %v82_v1 = vand.u32 127, %v81_v0  ;;  %114 = vperm.xlu1 %173, %v80_v7   ;;  %73 = vst.msk [vmem:[#allocation5] sm:$0x3] %vm72_vm3, %v229_v13  ;;  %v79_v14 = vld [vmem:[#allocation2] sm:$0xff]  ;;  %v102_v16 = vshrl.u32 %v81_v0, 7  ;;  %s144_s2 = sshll.u32 %s230_s0, 4  ;;  %s145_s2 = int_to_ptr.vmem [resolvable:$true] %s144_s2 }
   0x8   :  { %v111_v17 = vsub.f32 0.0, %v79_v14 }
   0x9   :  { %v84_v3 = vsel %vm83_vm1, %v82_v1, 8  ;;  %vm107_vm4 = vcmp.lt.s32.totalorder %v102_v16, 4 }
   0xa   :  { %v86_v4 = vsel %vm85_vm0, %v84_v3, 2147483647 }
   0xb   :  { %v88_v5 = vshra.s32 %v86_v4, 16  ;;  %v87_v9 = vand.u32 65535, %v86_v4 }
   0xd   :  { %v90_v6 = vcvt.s32.f32 %v88_v5  ;;  %v89_v10 = vcvt.s32.f32 %v87_v9 }
   0xe   :  { %v135_v40 = vld [vmem:[#allocation5] sm:$0x3] }
   0xf   :  { %91 = vmin.xlane.f32.xlu0 %v90_v6 }
  0x79   :  { %v115_v19 = vpop.permute.xlu1 %114 }
  0x7a   :  { %v117_v23 = vmul.f32 %v115_v19, %v111_v17 }
  0x82   :  { %v92_v11 = vpop.xlane.xlu0 %91 }
  0x83   :  { %vm93_vm2 = vcmp.eq.f32.partialorder %v90_v6, %v92_v11  ;;  %v98_v15 = vcvt.f32.s32 %v92_v11 }
  0x84   :  { %v94_v12 = vsel %vm93_vm2, %v89_v10, inf }
  0x85   :  { %95 = vmin.xlane.f32.xlu0 %v94_v12  ;;  %v99_v20 = vshll.u32 %v98_v15, 16 }
  0xf8   :  { %v96_v18 = vpop.xlane.xlu0 %95 }
  0xf9   :  { %v97_v21 = vcvt.f32.s32 %v96_v18 }
  0xfb   :  { %v100_v22 = vadd.s32 %v99_v20, %v97_v21 }
  0xfd   :  { %vm106_vm5 = vcmp.le.s32.totalorder %v82_v1, %v100_v22 }
  0xfe   :  { %vm108_vm6 = vmand %vm106_vm5, %vm107_vm4 }
  0xff   :  { %v168_v24 = vsel %vm108_vm6, 1.0, %v229_v13  ;;  %v118_v25 = vsel %vm108_vm6, %v117_v23, 0.0 }
 0x100   :  { %v119_v26 = vsel %vm85_vm0, %v118_v25, 0.0  ;;  %v126_v27 = vsel %vm85_vm0, %v168_v24, 0.0 }
 0x101   :  { %v120_v28 = vrot.slane %v119_v26, 4  ;;  %v127_v29 = vrot.slane %v126_v27, 4 }
 0x103   :  { %v121_v30 = vadd.f32 %v120_v28, %v119_v26  ;;  %v128_v31 = vadd.f32 %v127_v29, %v126_v27 }
 0x105   :  { %v122_v32 = vrot.slane %v121_v30, 2  ;;  %v129_v33 = vrot.slane %v128_v31, 2 }
 0x107   :  { %v123_v34 = vadd.f32 %v122_v32, %v121_v30  ;;  %v130_v35 = vadd.f32 %v129_v33, %v128_v31 }
 0x109   :  { %v124_v36 = vrot.slane %v123_v34, 1  ;;  %v131_v37 = vrot.slane %v130_v35, 1 }
 0x10b   :  { %v125_v38 = vadd.f32 %v124_v36, %v123_v34  ;;  %v132_v39 = vadd.f32 %v131_v37, %v130_v35 }
 0x10d   :  { %v134_v41 = vsel %vm133_vm7, %v125_v38, %v132_v39 }
 0x10e   :  { %v136_v42 = vadd.f32 %v135_v40, %v134_v41 }
 0x110   :  { %138 = vst.msk [vmem:[#allocation5] sm:$0x3] %vm72_vm3, %v136_v42 }
 0x111   :  { %149 = dma.vmem_to_hbm [thread:$0]  %s145_s2, 32, %s147_s22, [#allocation4]  }
 0x112   :  { %225 = dma.done.wait [#allocation4], 32  }
 0x113   :  { %226 = vsyncadd [#allocation4], 4294967264 }
 0x114   :  { %154 = vsyncpa [#allocation3], 1 }
 0x115   :  { %155 = vsyncpa [#allocation4], 1 }

</bundles_post_ra>
